<compile_context>
chip_gen: v7x
topology: tpu7x:2x2x1
jax: 0.10.0
libtpu: 0.0.40
codegen_flags: <defaults>
</compile_context>

<pallas_src>
import functools

import jax
import jax.numpy as jnp
from jax import lax
from jax.experimental import pallas as pl
from jax.experimental.pallas import tpu as pltpu

_SQRT_2_OVER_PI = 0.7978845608028654
_GELU_C = 0.044715


def _round_up(x, m):
    return (x + m - 1) // m * m


def _default_vmem_budget_bytes():
    # Leave ~40% of per-core VMEM for compiler scratch / pipeline buffers.
    # v5e/v6e: 128 MiB -> ~76 MiB budget; v7x: 64 MiB -> ~38 MiB budget.
    try:
        return int(pltpu.get_tpu_info().vmem_capacity_bytes * 0.6)
    except Exception:
        return 40 * 1024 * 1024  # safe on every generation (incl. v7x's 64 MiB)


def _fused_head_kernel(x_ref, wd_ref, bd_ref, g_ref, b_ref, we_ref, db_ref,
                       o_ref, h_scr, *, eps):
    i = pl.program_id(1)

    # --- BertHeadTransform: dense -> gelu -> LayerNorm, once per row tile (first vocab tile). ---
    @pl.when(pl.program_id(0) == 0)
    def _():
        # x @ Wd^T: Wd stays in its PyTorch (out, in) layout; contract last dims of both operands.
        h = lax.dot_general(x_ref[...], wd_ref[...], (((1,), (1,)), ((), ())),
                            preferred_element_type=jnp.float32)
        h = h + bd_ref[...].astype(jnp.float32)

        # GELU activation (tanh approximation), few VPU multiplies.
        # TODO(synk): HF BERT ACT2FN['gelu'] is erf-based; tanh approx differs by < 1e-3.
        inner = _SQRT_2_OVER_PI * h * (1.0 + _GELU_C * h * h)
        h = 0.5 * h * (1.0 + jnp.tanh(inner))

        # BertLayerNorm over the hidden dim (biased variance), math in f32.
        mu = jnp.mean(h, axis=-1, keepdims=True)
        var = jnp.mean((h - mu) ** 2, axis=-1, keepdims=True)
        h = (h - mu) * lax.rsqrt(var + eps)
        h = h * g_ref[...].astype(jnp.float32) + b_ref[...].astype(jnp.float32)

        # Keep h resident in VMEM (bf16 in production) for all vocab tiles of this row tile.
        h_scr[i] = h.astype(h_scr.dtype)

    # --- Decoder: h @ W_emb^T for this (row tile, vocab tile) block. ---
    logits = lax.dot_general(h_scr[i], we_ref[...], (((1,), (1,)), ((), ())),
                             preferred_element_type=jnp.float32)
    o_ref[...] = (logits + db_ref[...].astype(jnp.float32)).astype(o_ref.dtype)


def bert_lm_token_head(hidden_states, params, *, eps=1e-12,
                       row_tile=512, vocab_tile=2048,
                       compute_dtype=jnp.bfloat16, out_dtype=None,
                       vmem_budget_bytes=None):
    """hidden_states: (B, S, H). Returns logits (B, S, V) in `out_dtype` (default compute_dtype)."""
    B, S, H = hidden_states.shape
    N = B * S
    if out_dtype is None:
        out_dtype = compute_dtype
    if vmem_budget_bytes is None:
        vmem_budget_bytes = _default_vmem_budget_bytes()

    # Params kept in their PyTorch layouts. Only dtype casts (no-ops if already bf16);
    # no transposes, no pads, no output slices -> no extra full-tensor HBM copies.
    wd = jnp.asarray(params["dense_w"], compute_dtype)     # (H_out, H_in)
    bd = jnp.asarray(params["dense_b"]).reshape(1, H)
    g = jnp.asarray(params["ln_gamma"]).reshape(1, H)
    b = jnp.asarray(params["ln_beta"]).reshape(1, H)
    we = jnp.asarray(params["emb_w"], compute_dtype)       # (V, H) tied embedding weights
    V = we.shape[0]
    db = jnp.asarray(params["dec_bias"]).reshape(1, V)
    x = jnp.asarray(hidden_states, compute_dtype).reshape(N, H)

    # Tile sizes: clamp for small problems, keep (8, 128) alignment.
    row_tile = _round_up(max(8, min(row_tile, _round_up(N, 8))), 8)
    vocab_tile = _round_up(max(128, min(vocab_tile, _round_up(V, 128))), 128)

    c_bytes = jnp.dtype(compute_dtype).itemsize
    o_bytes = jnp.dtype(out_dtype).itemsize

    def stream_bytes(rt, vt):
        # Double-buffered streaming blocks (the resident h scratch is accounted separately).
        return (2 * rt * H * c_bytes            # x row tile
                + 2 * H * H * c_bytes           # dense weight (constant index -> fetched once)
                + 2 * vt * H * c_bytes          # embedding-weight tile
                + 2 * rt * vt * o_bytes         # logits tile
                + 2 * vt * 4 + 8 * H * 4)       # decoder bias / dense bias / LN params

    # Per-generation sizing: shrink tiles if the streaming buffers alone would blow the budget
    # (e.g. f32 mode on v7x's 64 MiB VMEM).
    while vocab_tile > 512 and stream_bytes(row_tile, vocab_tile) > vmem_budget_bytes // 2:
        vocab_tile //= 2
    while row_tile > 256 and stream_bytes(row_tile, vocab_tile) > vmem_budget_bytes // 2:
        row_tile //= 2

    # Rows of h that can stay resident next to the streaming buffers; larger N is processed in
    # row chunks (each chunk re-streams the embedding weight once).
    free = vmem_budget_bytes - stream_bytes(row_tile, vocab_tile)
    chunk_rows = max(1, free // (row_tile * H * c_bytes)) * row_tile

    n_vocab_tiles = pl.cdiv(V, vocab_tile)

    def run_chunk(x_chunk):
        n = x_chunk.shape[0]
        n_row_tiles = pl.cdiv(n, row_tile)
        return pl.pallas_call(
            functools.partial(_fused_head_kernel, eps=eps),
            out_shape=jax.ShapeDtypeStruct((n, V), out_dtype),
            grid=(n_vocab_tiles, n_row_tiles),
            in_specs=[
                # x is only consumed while j == 0; pinning its block index to 0 for j > 0 stops
                # Pallas from re-streaming activations once h lives in the VMEM scratch.
                pl.BlockSpec((row_tile, H), lambda j, i: (jnp.where(j == 0, i, 0), 0)),
                pl.BlockSpec((H, H), lambda j, i: (0, 0)),            # dense weight (resident)
                pl.BlockSpec((1, H), lambda j, i: (0, 0)),            # dense bias
                pl.BlockSpec((1, H), lambda j, i: (0, 0)),            # LN gamma
                pl.BlockSpec((1, H), lambda j, i: (0, 0)),            # LN beta
                pl.BlockSpec((vocab_tile, H), lambda j, i: (j, 0)),   # embedding-weight tile
                pl.BlockSpec((1, vocab_tile), lambda j, i: (0, j)),   # decoder bias tile
            ],
            out_specs=pl.BlockSpec((row_tile, vocab_tile), lambda j, i: (i, j)),
            scratch_shapes=[pltpu.VMEM((n_row_tiles, row_tile, H), compute_dtype)],
            compiler_params=pltpu.CompilerParams(
                # Vocab axis carries the h-scratch dependency -> "arbitrary"; row axis is split
                # across TensorCores on v7x so each core's h stays local to its VMEM.
                dimension_semantics=("arbitrary", "parallel"),
                vmem_limit_bytes=int(vmem_budget_bytes),
            ),
        )(x_chunk, wd, bd, g, b, we, db)

    if chunk_rows >= N:
        logits = run_chunk(x)
    else:
        # TODO(synk): very large N falls back to row chunks + concatenate (one extra logits copy);
        # a third "row super-tile" grid axis would avoid it.
        logits = jnp.concatenate(
            [run_chunk(x[s:s + chunk_rows]) for s in range(0, N, chunk_rows)], axis=0)

    return logits.reshape(B, S, V)


def _reference(hidden_states, params, eps=1e-12):
    x = hidden_states.astype(jnp.float32)
    h = jnp.einsum("bsh,oh->bso", x, params["dense_w"]) + params["dense_b"]
    h = 0.5 * h * (1.0 + jnp.tanh(_SQRT_2_OVER_PI * (h + _GELU_C * h ** 3)))
    mu = jnp.mean(h, axis=-1, keepdims=True)
    var = jnp.mean((h - mu) ** 2, axis=-1, keepdims=True)
    h = (h - mu) / jnp.sqrt(var + eps)
    h = h * params["ln_gamma"] + params["ln_beta"]
    return jnp.einsum("bsh,vh->bsv", h, params["emb_w"]) + params["dec_bias"]


if __name__ == "__main__":
    B, S, H, V = 2, 8, 32, 256

    key = jax.random.PRNGKey(0)
    k0, k1, k2, k3, k4 = jax.random.split(key, 5)

    hidden_states = jax.random.normal(k0, (B, S, H), dtype=jnp.float32)
    params = {
        "dense_w": 0.02 * jax.random.normal(k1, (H, H), dtype=jnp.float32),
        "dense_b": 0.01 * jax.random.normal(k3, (H,), dtype=jnp.float32),
        "ln_gamma": jnp.ones((H,), dtype=jnp.float32),
        "ln_beta": jnp.zeros((H,), dtype=jnp.float32),
        "emb_w": 0.02 * jax.random.normal(k2, (V, H), dtype=jnp.float32),
        "dec_bias": 0.01 * jax.random.normal(k4, (V,), dtype=jnp.float32),
    }

    ref = _reference(hidden_states, params)

    # Full-precision path: tight check of the kernel math.
    logits_f32 = bert_lm_token_head(hidden_states, params, compute_dtype=jnp.float32)
    logits_f32 = jax.block_until_ready(logits_f32)
    assert logits_f32.shape == (B, S, V)
    assert jnp.allclose(logits_f32, ref, rtol=1e-4, atol=1e-4)

    # Production path (bf16 streams, f32 accumulation): looser tolerance vs the f32 reference.
    logits_bf16 = bert_lm_token_head(hidden_states, params)
    logits_bf16 = jax.block_until_ready(logits_bf16)
    assert logits_bf16.shape == (B, S, V)
    assert jnp.allclose(logits_bf16.astype(jnp.float32), ref, rtol=3e-2, atol=3e-2)

    print("KERNEL_OK")
</pallas_src>

<mosaic_0001>
module attributes {stable_mosaic.version = 11 : i64} {
  func.func @_fused_head_kernel(%arg0: i32, %arg1: i32, %arg2: memref<16x32xf32, #tpu.memory_space<vmem>>, %arg3: memref<32x32xf32, #tpu.memory_space<vmem>>, %arg4: memref<1x32xf32, #tpu.memory_space<vmem>>, %arg5: memref<1x32xf32, #tpu.memory_space<vmem>>, %arg6: memref<1x32xf32, #tpu.memory_space<vmem>>, %arg7: memref<256x32xf32, #tpu.memory_space<vmem>>, %arg8: memref<1x256xf32, #tpu.memory_space<vmem>>, %arg9: memref<16x256xf32, #tpu.memory_space<vmem>>, %arg10: memref<1x16x32xf32, #tpu.memory_space<vmem>>) attributes {dimension_semantics = [#tpu.dimension_semantics<arbitrary>, #tpu.dimension_semantics<parallel>], iteration_bounds = array<i64: 1, 1>, scalar_prefetch = 0 : i64, scratch_operands = 1 : i64, tpu.core_type = #tpu.core_type<tc>, window_params = [{transform_indices = @transform_0, window_bounds = array<i64: 16, 32>}, {pipeline_mode = #tpu.pipeline_mode<synchronous>, transform_indices = @transform_1, window_bounds = array<i64: 32, 32>}, {pipeline_mode = #tpu.pipeline_mode<synchronous>, transform_indices = @transform_2, window_bounds = array<i64: 1, 32>}, {pipeline_mode = #tpu.pipeline_mode<synchronous>, transform_indices = @transform_3, window_bounds = array<i64: 1, 32>}, {pipeline_mode = #tpu.pipeline_mode<synchronous>, transform_indices = @transform_4, window_bounds = array<i64: 1, 32>}, {transform_indices = @transform_5, window_bounds = array<i64: 256, 32>}, {transform_indices = @transform_6, window_bounds = array<i64: 1, 256>}, {transform_indices = @transform_7, window_bounds = array<i64: 16, 256>}]} {
    %c0_i32 = arith.constant 0 : i32
    %0 = arith.cmpi eq, %arg0, %c0_i32 : i32
    %1 = arith.extui %0 : i1 to i32
    %c0_i32_0 = arith.constant 0 : i32
    %2 = arith.cmpi ne, %1, %c0_i32_0 : i32
    scf.if %2 {
      %c0_8 = arith.constant 0 : index
      %c0_9 = arith.constant 0 : index
      %12 = vector.load %arg2[%c0_8, %c0_9] : memref<16x32xf32, #tpu.memory_space<vmem>>, vector<16x32xf32>
      %c0_10 = arith.constant 0 : index
      %c0_11 = arith.constant 0 : index
      %13 = vector.load %arg3[%c0_10, %c0_11] : memref<32x32xf32, #tpu.memory_space<vmem>>, vector<32x32xf32>
      %cst_12 = arith.constant dense<0.000000e+00> : vector<16x32xf32>
      %14 = tpu.matmul %12, %13, %cst_12 {dimension_numbers = #tpu.dot_dimension_numbers<[1], [1], [0], [0], [0, 0, 1, 0], [], []>} : vector<16x32xf32>, vector<32x32xf32>, vector<16x32xf32> -> vector<16x32xf32>
      %c0_13 = arith.constant 0 : index
      %c0_14 = arith.constant 0 : index
      %15 = vector.load %arg4[%c0_13, %c0_14] : memref<1x32xf32, #tpu.memory_space<vmem>>, vector<1x32xf32>
      %16 = vector.broadcast %15 : vector<1x32xf32> to vector<16x32xf32>
      %17 = arith.addf %14, %16 : vector<16x32xf32>
      %cst_15 = arith.constant 0.797884583 : f32
      %18 = vector.broadcast %cst_15 : f32 to vector<16x32xf32>
      %19 = arith.mulf %18, %17 : vector<16x32xf32>
      %cst_16 = arith.constant 4.471500e-02 : f32
      %20 = vector.broadcast %cst_16 : f32 to vector<16x32xf32>
      %21 = arith.mulf %20, %17 : vector<16x32xf32>
      %22 = arith.mulf %21, %17 : vector<16x32xf32>
      %cst_17 = arith.constant 1.000000e+00 : f32
      %23 = vector.broadcast %cst_17 : f32 to vector<16x32xf32>
      %24 = arith.addf %23, %22 : vector<16x32xf32>
      %25 = arith.mulf %19, %24 : vector<16x32xf32>
      %cst_18 = arith.constant 5.000000e-01 : f32
      %26 = vector.broadcast %cst_18 : f32 to vector<16x32xf32>
      %27 = arith.mulf %26, %17 : vector<16x32xf32>
      %28 = math.tanh %25 : vector<16x32xf32>
      %cst_19 = arith.constant 1.000000e+00 : f32
      %29 = vector.broadcast %cst_19 : f32 to vector<16x32xf32>
      %30 = arith.addf %29, %28 : vector<16x32xf32>
      %31 = arith.mulf %27, %30 : vector<16x32xf32>
      %cst_20 = arith.constant dense<0.000000e+00> : vector<16xf32>
      %32 = vector.multi_reduction <add>, %31, %cst_20 [1] : vector<16x32xf32> to vector<16xf32>
      %33 = vector.shape_cast %32 : vector<16xf32> to vector<16x1xf32>
      %cst_21 = arith.constant 3.200000e+01 : f32
      %34 = vector.broadcast %cst_21 : f32 to vector<16x1xf32>
      %35 = arith.divf %33, %34 : vector<16x1xf32>
      %36 = vector.broadcast %35 : vector<16x1xf32> to vector<16x32xf32>
      %37 = arith.subf %31, %36 : vector<16x32xf32>
      %38 = arith.mulf %37, %37 : vector<16x32xf32>
      %cst_22 = arith.constant dense<0.000000e+00> : vector<16xf32>
      %39 = vector.multi_reduction <add>, %38, %cst_22 [1] : vector<16x32xf32> to vector<16xf32>
      %40 = vector.shape_cast %39 : vector<16xf32> to vector<16x1xf32>
      %cst_23 = arith.constant 3.200000e+01 : f32
      %41 = vector.broadcast %cst_23 : f32 to vector<16x1xf32>
      %42 = arith.divf %40, %41 : vector<16x1xf32>
      %43 = vector.broadcast %35 : vector<16x1xf32> to vector<16x32xf32>
      %44 = arith.subf %31, %43 : vector<16x32xf32>
      %cst_24 = arith.constant 9.99999996E-13 : f32
      %45 = vector.broadcast %cst_24 : f32 to vector<16x1xf32>
      %46 = arith.addf %42, %45 : vector<16x1xf32>
      %47 = math.rsqrt %46 : vector<16x1xf32>
      %48 = vector.broadcast %47 : vector<16x1xf32> to vector<16x32xf32>
      %49 = arith.mulf %44, %48 : vector<16x32xf32>
      %c0_25 = arith.constant 0 : index
      %c0_26 = arith.constant 0 : index
      %50 = vector.load %arg5[%c0_25, %c0_26] : memref<1x32xf32, #tpu.memory_space<vmem>>, vector<1x32xf32>
      %51 = vector.broadcast %50 : vector<1x32xf32> to vector<16x32xf32>
      %52 = arith.mulf %49, %51 : vector<16x32xf32>
      %c0_27 = arith.constant 0 : index
      %c0_28 = arith.constant 0 : index
      %53 = vector.load %arg6[%c0_27, %c0_28] : memref<1x32xf32, #tpu.memory_space<vmem>>, vector<1x32xf32>
      %54 = vector.broadcast %53 : vector<1x32xf32> to vector<16x32xf32>
      %55 = arith.addf %52, %54 : vector<16x32xf32>
      %56 = arith.index_cast %arg1 : i32 to index
      %c0_29 = arith.constant 0 : index
      %c0_30 = arith.constant 0 : index
      %57 = vector.load %arg10[%56, %c0_29, %c0_30] : memref<1x16x32xf32, #tpu.memory_space<vmem>>, vector<1x16x32xf32>
      %58 = vector.shape_cast %57 : vector<1x16x32xf32> to vector<16x32xf32>
      %59 = vector.shape_cast %55 : vector<16x32xf32> to vector<1x16x32xf32>
      tpu.vector_store %arg10[%56, %c0_29, %c0_30], %59 {strides = array<i32>} : memref<1x16x32xf32, #tpu.memory_space<vmem>>, vector<1x16x32xf32>,
    } else {
    }
    %3 = arith.index_cast %arg1 : i32 to index
    %c0 = arith.constant 0 : index
    %c0_1 = arith.constant 0 : index
    %4 = vector.load %arg10[%3, %c0, %c0_1] : memref<1x16x32xf32, #tpu.memory_space<vmem>>, vector<1x16x32xf32>
    %5 = vector.shape_cast %4 : vector<1x16x32xf32> to vector<16x32xf32>
    %c0_2 = arith.constant 0 : index
    %c0_3 = arith.constant 0 : index
    %6 = vector.load %arg7[%c0_2, %c0_3] : memref<256x32xf32, #tpu.memory_space<vmem>>, vector<256x32xf32>
    %cst = arith.constant dense<0.000000e+00> : vector<16x256xf32>
    %7 = tpu.matmul %5, %6, %cst {dimension_numbers = #tpu.dot_dimension_numbers<[1], [1], [0], [0], [0, 0, 1, 0], [], []>} : vector<16x32xf32>, vector<256x32xf32>, vector<16x256xf32> -> vector<16x256xf32>
    %c0_4 = arith.constant 0 : index
    %c0_5 = arith.constant 0 : index
    %8 = vector.load %arg8[%c0_4, %c0_5] : memref<1x256xf32, #tpu.memory_space<vmem>>, vector<1x256xf32>
    %9 = vector.broadcast %8 : vector<1x256xf32> to vector<16x256xf32>
    %10 = arith.addf %7, %9 : vector<16x256xf32>
    %c0_6 = arith.constant 0 : index
    %c0_7 = arith.constant 0 : index
    %11 = vector.load %arg9[%c0_6, %c0_7] : memref<16x256xf32, #tpu.memory_space<vmem>>, vector<16x256xf32>
    tpu.vector_store %arg9[%c0_6, %c0_7], %10 {strides = array<i32>} : memref<16x256xf32, #tpu.memory_space<vmem>>, vector<16x256xf32>,
    return
  }
  func.func @transform_0(%arg0: i32, %arg1: i32) -> (i32, i32) {
    %c0_i32 = arith.constant 0 : i32
    %0 = arith.cmpi eq, %arg0, %c0_i32 : i32
    %c0_i32_0 = arith.constant 0 : i32
    %1 = arith.select %0, %arg1, %c0_i32_0 : i32
    %c0_i32_1 = arith.constant 0 : i32
    %c0_i32_2 = arith.constant 0 : i32
    return %1, %c0_i32_1 : i32, i32
  }
  func.func @transform_1(%arg0: i32, %arg1: i32) -> (i32, i32) {
    %c0_i32 = arith.constant 0 : i32
    %c0_i32_0 = arith.constant 0 : i32
    %c0_i32_1 = arith.constant 0 : i32
    return %c0_i32, %c0_i32_0 : i32, i32
  }
  func.func @transform_2(%arg0: i32, %arg1: i32) -> (i32, i32) {
    %c0_i32 = arith.constant 0 : i32
    %c0_i32_0 = arith.constant 0 : i32
    %c0_i32_1 = arith.constant 0 : i32
    return %c0_i32, %c0_i32_0 : i32, i32
  }
  func.func @transform_3(%arg0: i32, %arg1: i32) -> (i32, i32) {
    %c0_i32 = arith.constant 0 : i32
    %c0_i32_0 = arith.constant 0 : i32
    %c0_i32_1 = arith.constant 0 : i32
    return %c0_i32, %c0_i32_0 : i32, i32
  }
  func.func @transform_4(%arg0: i32, %arg1: i32) -> (i32, i32) {
    %c0_i32 = arith.constant 0 : i32
    %c0_i32_0 = arith.constant 0 : i32
    %c0_i32_1 = arith.constant 0 : i32
    return %c0_i32, %c0_i32_0 : i32, i32
  }
  func.func @transform_5(%arg0: i32, %arg1: i32) -> (i32, i32) {
    %c0_i32 = arith.constant 0 : i32
    %c0_i32_0 = arith.constant 0 : i32
    return %arg0, %c0_i32 : i32, i32
  }
  func.func @transform_6(%arg0: i32, %arg1: i32) -> (i32, i32) {
    %c0_i32 = arith.constant 0 : i32
    %c0_i32_0 = arith.constant 0 : i32
    return %c0_i32, %arg0 : i32, i32
  }
  func.func @transform_7(%arg0: i32, %arg1: i32) -> (i32, i32) {
    %c0_i32 = arith.constant 0 : i32
    return %arg1, %arg0 : i32, i32
  }
}

</mosaic_0001>

<bundles_post_ra>
// kernel: tpu_custom_call.1
= control target key start
LH: loop header
LB: loop body
LE: loop exit
PB: predicated region body
PF: predicated region fallthrough
CT: control target
= control target key end

     0   :  { %vm71_vm0 = vcmask 261120   ;;  %s916_s0 = inlined_call_operand.vmem [shape: f32[16,32], index: 0, kind: input, shape index: {}]   ;;  %s917_s1 = inlined_call_operand.vmem [shape: f32[32,32], index: 1, kind: input, shape index: {}]   ;;  %s918_s2 = inlined_call_operand.vmem [shape: f32[1,32], index: 2, kind: input, shape index: {}]   ;;  %s919_s3 = inlined_call_operand.vmem [shape: f32[1,32], index: 3, kind: input, shape index: {}]   ;;  %s920_s4 = inlined_call_operand.vmem [shape: f32[1,32], index: 4, kind: input, shape index: {}]   ;;  %s921_s5 = inlined_call_operand.vmem [shape: f32[256,32], index: 5, kind: input, shape index: {}]   ;;  %s922_s6 = inlined_call_operand.vmem [shape: f32[1,256], index: 6, kind: input, shape index: {}]   ;;  %s923_s7 = inlined_call_operand.hbm [shape: f32[16,256], index: 7, kind: output, shape index: {}]  }
   0x1   :  { %v60_v0 = vld [vmem:[%s917_s1] sm:$0xff]  ;;  %v61_v1 = vld [vmem:[%s917_s1 + $0x8] sm:$0xff]  ;;  %v62_v2 = vld [vmem:[%s917_s1 + $0x10] sm:$0xff] }
   0x2   :  { %v582_v3 = vpack.c.bf16 %v61_v1, %v60_v0  ;;  %vm731_vm1 = vmpackc.low %vm71_vm0, %vm71_vm0  ;;  %v63_v5 = vld [vmem:[%s917_s1 + $0x18] sm:$0xff]  ;;  %v58_v6 = vld [vmem:[%s916_s0] sm:$0xff] }
   0x3   :  { %v588_v7 = vpack.c.bf16 %v63_v5, %v62_v2  ;;  %579 = vmatprep.mubr.msk.f32.mxu0 %vm71_vm0, %v58_v6 }
   0x4   :  { %12 = vsyncpa [#allocation4], 0  ;;  %584 = vmatprep.subr.msk.bf16.mxu0 %vm731_vm1, %v582_v3  ;;  %v59_v8 = vld [vmem:[%s916_s0 + $0x8] sm:$0xff]  ;;  %v486_v9 = vld [vmem:[%s918_s2] ss:$0 sm:$0xff]  ;;  %s677_s27 = smov [#allocation3]  }
   0x5   :  { %587 = vmatpush3.bf16.xpose.msk.msra.mxu0 %vm731_vm1, %v582_v3  ;;  %v252_v34 = vld [vmem:[%s921_s5 + $0x80] sm:$0xff]  ;;  %v253_v35 = vld [vmem:[%s921_s5 + $0x88] sm:$0xff]  ;;  %v254_v39 = vld [vmem:[%s921_s5 + $0x90] sm:$0xff]  ;;  %s469_s28 = sshll.u32 %s677_s27, 4  ;;  %s470_s28 = int_to_ptr.vmem [resolvable:$true] %s469_s28 }
   0x6   :  { %590 = vmatprep.subr.msk.bf16.mxu0 %vm731_vm1, %v588_v7  ;;  %v236_v36 = vld [vmem:[%s921_s5] sm:$0xff]  ;;  %v594_v37 = vpack.c.bf16 %v253_v35, %v252_v34  ;;  %v237_v38 = vld [vmem:[%s921_s5 + $0x8] sm:$0xff]  ;;  %v255_v40 = vld [vmem:[%s921_s5 + $0x98] sm:$0xff]  ;;  %s653_s29 = scalar_lea.vmem %s470_s28, 512  ;;  %p658_p1 = scmp.lt.s32.totalorder %s470_s28, %s470_s28 }
   0x7   :  { %v597_v41 = vpack.c.bf16 %v237_v38, %v236_v36  ;;  %v600_v42 = vpack.c.bf16 %v255_v40, %v254_v39  ;;  %v238_v43 = vld [vmem:[%s921_s5 + $0x10] sm:$0xff]  ;;  %v239_v44 = vld [vmem:[%s921_s5 + $0x18] sm:$0xff]  ;;  %v256_v45 = vld [vmem:[%s921_s5 + $0xa0] sm:$0xff]  ;;  %p654_p0 = scmp.ne.s32.totalorder %s470_s28, %s653_s29  ;;  %p659_p2 = scmp.lt.s32.totalorder %s653_s29, %s653_s29 }
   0x8   :  { %596 = vmatprep.subr.msk.bf16.mxu1 %vm731_vm1, %v594_v37  ;;  %v257_v46 = vld [vmem:[%s921_s5 + $0xa8] sm:$0xff]  ;;  %v603_v47 = vpack.c.bf16 %v239_v44, %v238_v43  ;;  %v240_v49 = vld [vmem:[%s921_s5 + $0x20] sm:$0xff]  ;;  %v258_v51 = vld [vmem:[%s921_s5 + $0xb0] sm:$0xff] }
   0x9   :  { %599 = vmatpush3.bf16.xpose.msk.msra.mxu1 %vm731_vm1, %v597_v41  ;;  %v606_v48 = vpack.c.bf16 %v257_v46, %v256_v45  ;;  %v241_v50 = vld [vmem:[%s921_s5 + $0x28] sm:$0xff]  ;;  %v259_v52 = vld [vmem:[%s921_s5 + $0xb8] sm:$0xff]  ;;  %v242_v55 = vld [vmem:[%s921_s5 + $0x30] sm:$0xff]  ;;  %v270_v46 = vlaneseq  ;;  %p660_p3 = por %p659_p2, %p658_p1 }
   0xa   :  { %602 = vmatprep.subr.msk.bf16.mxu1 %vm731_vm1, %v600_v42  ;;  %v609_v53 = vpack.c.bf16 %v241_v50, %v240_v49  ;;  %v612_v54 = vpack.c.bf16 %v259_v52, %v258_v51  ;;  %v243_v56 = vld [vmem:[%s921_s5 + $0x38] sm:$0xff]  ;;  %v260_v57 = vld [vmem:[%s921_s5 + $0xc0] sm:$0xff]  ;;  %v261_v58 = vld [vmem:[%s921_s5 + $0xc8] sm:$0xff] }
   0xb   :  { %v615_v59 = vpack.c.bf16 %v243_v56, %v242_v55  ;;  %v618_v60 = vpack.c.bf16 %v261_v58, %v260_v57  ;;  %v244_v61 = vld [vmem:[%s921_s5 + $0x40] sm:$0xff]  ;;  %v245_v62 = vld [vmem:[%s921_s5 + $0x48] sm:$0xff]  ;;  %p661_p4 = pnand %p660_p3, %p654_p0 }
   0xc   :  { %v621_v63 = vpack.c.bf16 %v245_v62, %v244_v61  ;;  %v493_v36 = vld [vmem:[%s919_s3] ss:$0 sm:$0xff] }
   0xd   :  { %593 = vmatpush3.bf16.xpose.msk.msra.mxu0 %vm731_vm1, %v588_v7  ;;  %v494_v38 = vld [vmem:[%s920_s4] ss:$0 sm:$0xff] }
   0xe   :  { %v268_v49 = vld [vmem:[%s922_s6] sm:$0x3] }
  0x11   :  { %605 = vmatpush3.bf16.xpose.msk.msra.mxu1 %vm731_vm1, %v603_v47  ;;  %v271_v47 = vshrl.u32 %v270_v46, 7 }
  0x12   :  { %608 = vmatprep.subr.msk.bf16.mxu1 %vm731_vm1, %v606_v48 }
  0x13   :  { %v272_v48 = vsub.s32 0, %v271_v47  ;;  %v276_v50 = vsub.s32 1, %v271_v47 }
  0x14   :  { %580 = vmatmul.mubr.msk.f32.vlgmr.msra.gmra.mrb[0].mxu0 %vm71_vm0, %v59_v8 }
  0x15   :  { %v273_v51 = vrot.slane %v268_v49, %v272_v48  ;;  %v277_v52 = vrot.slane %v268_v49, %v276_v50 }
  0x19   :  { %611 = vmatpush3.bf16.xpose.msk.msra.mxu1 %vm731_vm1, %v609_v53 }
  0x1a   :  { %614 = vmatprep.subr.msk.bf16.mxu1 %vm731_vm1, %v612_v54 }
  0x21   :  { %617 = vmatpush3.bf16.xpose.msk.msra.mxu1 %vm731_vm1, %v615_v59 }
  0x22   :  { %620 = vmatprep.subr.msk.bf16.mxu1 %vm731_vm1, %v618_v60 }
  0x29   :  { %623 = vmatpush3.bf16.xpose.msk.msra.mxu1 %vm731_vm1, %v621_v63 }
  0xe7   :  { %v581_v10 = vpop.f32.mrb[0].mxu0 }
  0xe8   :  { %v162_v11 = vadd.f32 %v581_v10, %v486_v9  ;;  %v156_v12 = vpop.f32.mrb[1].mxu0 }
  0xe9   :  { %v157_v13 = vadd.f32 %v486_v9, %v156_v12  ;;  %v263_v12 = vld [vmem:[%s921_s5 + $0xd8] sm:$0xff] }
  0xea   :  { %v168_v14 = vmul.f32 0.044715, %v162_v11  ;;  %v166_v18 = vmul.f32 0.7978846, %v162_v11  ;;  %v176_v30 = vmul.f32 0.5, %v162_v11 }
  0xeb   :  { %v167_v15 = vmul.f32 0.044715, %v157_v13  ;;  %v165_v20 = vmul.f32 0.7978846, %v157_v13  ;;  %v175_v26 = vmul.f32 0.5, %v157_v13 }
  0xec   :  { %v170_v16 = vmul.f32 %v168_v14, %v162_v11  ;;  %v262_v11 = vld [vmem:[%s921_s5 + $0xd0] sm:$0xff] }
  0xed   :  { %v169_v17 = vmul.f32 %v167_v15, %v157_v13  ;;  %v624_v13 = vpack.c.bf16 %v263_v12, %v262_v11  ;;  %v246_v14 = vld [vmem:[%s921_s5 + $0x50] sm:$0xff]  ;;  %v247_v15 = vld [vmem:[%s921_s5 + $0x58] sm:$0xff] }
  0xee   :  { %v172_v19 = vadd.f32 1.0, %v170_v16  ;;  %v627_v16 = vpack.c.bf16 %v247_v15, %v246_v14 }
  0xef   :  { %v171_v21 = vadd.f32 1.0, %v169_v17  ;;  %626 = vmatprep.subr.msk.bf16.mxu1 %vm731_vm1, %v624_v13  ;;  %v264_v17 = vld [vmem:[%s921_s5 + $0xe0] sm:$0xff] }
  0xf0   :  { %v174_v22 = vmul.f32 %v172_v19, %v166_v18  ;;  %629 = vmatpush3.bf16.xpose.msk.msra.mxu1 %vm731_vm1, %v627_v16  ;;  %v265_v18 = vld [vmem:[%s921_s5 + $0xe8] sm:$0xff] }
  0xf1   :  { %v173_v23 = vmul.f32 %v171_v21, %v165_v20  ;;  %v630_v19 = vpack.c.bf16 %v265_v18, %v264_v17  ;;  %v248_v20 = vld [vmem:[%s921_s5 + $0x60] sm:$0xff]  ;;  %v249_v21 = vld [vmem:[%s921_s5 + $0x68] sm:$0xff] }
  0xf2   :  { %645 = vtanh.f32 %v174_v22  ;;  %v633_v22 = vpack.c.bf16 %v249_v21, %v248_v20 }
  0xf3   :  { %647 = vtanh.f32 %v173_v23  ;;  %632 = vmatprep.subr.msk.bf16.mxu1 %vm731_vm1, %v630_v19  ;;  %v266_v23 = vld [vmem:[%s921_s5 + $0xf0] sm:$0xff] }
  0xf8   :  { %635 = vmatpush3.bf16.xpose.msk.msra.mxu1 %vm731_vm1, %v633_v22 }
  0xfc   :  { %v646_v24 = vpop.eup %645 }
  0xfd   :  { %v648_v25 = vpop.eup %647  ;;  %v180_v28 = vadd.f32 1.0, %v646_v24  ;;  %v267_v24 = vld [vmem:[%s921_s5 + $0xf8] sm:$0xff] }
  0xfe   :  { %v179_v27 = vadd.f32 1.0, %v648_v25  ;;  %v636_v25 = vpack.c.bf16 %v267_v24, %v266_v23 }
  0xff   :  { %v182_v32 = vmul.f32 %v180_v28, %v176_v30 }
 0x100   :  { %v181_v29 = vmul.f32 %v179_v27, %v175_v26  ;;  %v250_v26 = vld [vmem:[%s921_s5 + $0x70] sm:$0xff]  ;;  %v251_v27 = vld [vmem:[%s921_s5 + $0x78] sm:$0xff]  ;;  %638 = vmatprep.subr.msk.bf16.mxu1 %vm731_vm1, %v636_v25 }
 0x101   :  { %v186_v33 = vsel %vm71_vm0, %v182_v32, 0.0  ;;  %v639_v28 = vpack.c.bf16 %v251_v27, %v250_v26 }
 0x102   :  { %v183_v31 = vsel %vm71_vm0, %v181_v29, 0.0 }
 0x103   :  { %184 = vadd.xlane.f32.xlu0 %v183_v31  ;;  %641 = vmatpush3.bf16.xpose.msk.msra.mxu1 %vm731_vm1, %v639_v28 }
 0x107   :  { %187 = vadd.xlane.f32.xlu0 %v186_v33 }
 0x190   :  { %v185_v0 = vpop.xlane.xlu0 %184 }
 0x191   :  { %v190_v1 = vmul.f32 0.03125, %v185_v0 }
 0x193   :  { %v192_v2 = vsub.f32 %v181_v29, %v190_v1 }
 0x194   :  { %v188_v3 = vpop.xlane.xlu0 %187 }
 0x195   :  { %v191_v5 = vmul.f32 0.03125, %v188_v3  ;;  %v194_v6 = vmul.f32 %v192_v2, %v192_v2 }
 0x197   :  { %v193_v7 = vsub.f32 %v182_v32, %v191_v5  ;;  %v196_v8 = vsel %vm71_vm0, %v194_v6, 0.0 }
 0x198   :  { %197 = vadd.xlane.f32.xlu1 %v196_v8 }
 0x199   :  { %v195_v9 = vmul.f32 %v193_v7, %v193_v7 }
 0x19b   :  { %v199_v10 = vsel %vm71_vm0, %v195_v9, 0.0 }
 0x19c   :  { %200 = vadd.xlane.f32.xlu1 %v199_v10 }
 0x225   :  { %v198_v29 = vpop.xlane.xlu1 %197 }
 0x226   :  { %v202_v30 = vmul.f32 0.03125, %v198_v29 }
 0x228   :  { %v204_v31 = vadd.f32 1e-12, %v202_v30 }
 0x229   :  { %v201_v32 = vpop.xlane.xlu1 %200 }
 0x22a   :  { %649 = vrsqrt.f32 %v204_v31  ;;  %v203_v33 = vmul.f32 0.03125, %v201_v32 }
 0x22c   :  { %v205_v34 = vadd.f32 1e-12, %v203_v33 }
 0x22e   :  { %651 = vrsqrt.f32 %v205_v34 }
 0x234   :  { %v650_v35 = vpop.eup %649 }
 0x235   :  { %v208_v37 = vmul.f32 %v650_v35, %v192_v2 }
 0x237   :  { %v217_v4 = vmul.f32 %v493_v36, %v208_v37 }
 0x238   :  { %v652_v39 = vpop.eup %651 }
 0x239   :  { %v226_v40 = vadd.f32 %v494_v38, %v217_v4  ;;  %v209_v41 = vmul.f32 %v652_v39, %v193_v7 }
 0x23b   :  { %230 = vst.msk [vmem:[#allocation2] sm:$0xff] %vm71_vm0, %v226_v40  ;;  %v218_v42 = vmul.f32 %v493_v36, %v209_v41 }
 0x23d   :  { %v227_v43 = vadd.f32 %v494_v38, %v218_v42 }
 0x23f   :  { %231 = vst.msk [vmem:[#allocation2 + $0x8] sm:$0xff] %vm71_vm0, %v227_v43 }
 0x242   :  { %v234_v44 = vld [vmem:[#allocation2] sm:$0xff] }
 0x243   :  { %567 = vmatprep.mubr.msk.f32.mxu1 %vm71_vm0, %v234_v44 }
 0x244   :  { %568 = vmatmul.mubr.msk.f32.vlgmr.msra.gmra.mrb[0].mxu1 %vm71_vm0, %v234_v44 }
 0x246   :  { %v235_v45 = vld [vmem:[#allocation2 + $0x8] sm:$0xff] }
 0x247   :  { %569 = vmatprep.mubr.msk.f32.mxu1 %vm71_vm0, %v235_v45 }
 0x248   :  { %570 = vmatmul.mubr.msk.f32.gmra.mrb[2].mxu1 %vm71_vm0, %v235_v45 }
 0x317   :  { %v449_v53 = vpop.f32.mrb[0].mxu1 }
 0x318   :  { %v450_v54 = vadd.f32 %v449_v53, %v273_v51  ;;  %v451_v55 = vpop.f32.mrb[1].mxu1 }
 0x319   :  { %v452_v56 = vadd.f32 %v451_v55, %v277_v52 }
 0x31a   :  { %460 = vst [vmem:[#allocation3] sm:$0xff] %v450_v54 }
 0x31b   :  { %461 = vst [vmem:[#allocation3 + $0x8] sm:$0xff] %v452_v56  ;;  %v455_v57 = vpop.f32.mrb[2].mxu1 }
 0x31c   :  { %v456_v58 = vadd.f32 %v455_v57, %v273_v51  ;;  %v457_v59 = vpop.f32.mrb[3].mxu1 }
 0x31d   :  { %v458_v60 = vadd.f32 %v457_v59, %v277_v52 }
 0x31e   :  { %462 = vst [vmem:[#allocation3 + $0x10] sm:$0xff] %v456_v58 }
 0x31f   :  { %463 = vst [vmem:[#allocation3 + $0x18] sm:$0xff] %v458_v60 }
 0x320   :  { %664 = shalt.err (!%p661_p4)
}
 0x321   :  { %s665_s8 = scalar_lea.hbm %s923_s7, 512 }
 0x322   :  { %p666_p5 = scmp.ne.s32.totalorder %s923_s7, %s665_s8  ;;  %p669_p6 = scmp.lt.u32.totalorder %s665_s8, %s923_s7 }
 0x324   :  { %p671_p7 = pnand %p669_p6, %p666_p5 }
 0x326   :  { %674 = shalt.err (!%p671_p7)
}
 0x327   :  { %s678_s12 = smov 256   ;;  %s679_s13 = smov 16  }
 0x328   :  { %475 = dma.vmem_to_hbm [thread:$0]  %s470_s28, 512, %s923_s7, [#allocation4], %s678_s12, %s678_s12, %s679_s13  }
 0x329   :  { %675 = dma.done.wait [#allocation4], 512  }
 0x32a   :  { %676 = vsyncadd [#allocation4], 4294966784 }
 0x32b   :  { %479 = vsyncpa [#allocation4], 1 }

</bundles_post_ra>
